<compile_context>
chip_gen: v6e
topology: v6e:2x2x1
jax: 0.10.0
libtpu: 0.0.40
codegen_flags: <defaults>
</compile_context>

<pallas_src>
import functools

import jax
import jax.numpy as jnp
from jax.experimental import pallas as pl
from jax.experimental.pallas import tpu as pltpu


def _round_up(x, m):
    return ((x + m - 1) // m) * m


def _actor_kernel(s_ref, w1_ref, b1_ref, w2_ref, b2_ref, w3_ref, b3_ref,
                  o_ref, *, max_action):
    # layer 1: relu(state @ W1 + b1) -- state cast to bf16 here (in-kernel VPU
    # work instead of a separate XLA cast kernel), f32 MXU accumulation.
    a = jnp.dot(s_ref[...].astype(jnp.bfloat16), w1_ref[...],
                preferred_element_type=jnp.float32)
    a = jnp.maximum(a + b1_ref[...], 0.0)
    # layer 2: relu(a @ W2 + b2)
    a = jnp.dot(a.astype(jnp.bfloat16), w2_ref[...],
                preferred_element_type=jnp.float32)
    a = jnp.maximum(a + b2_ref[...], 0.0)
    # output layer: max_action * tanh(a @ W3 + b3)   (lane-dense padded A)
    out = jnp.dot(a.astype(jnp.bfloat16), w3_ref[...],
                  preferred_element_type=jnp.float32)
    out = jnp.tanh(out + b3_ref[...])
    o_ref[...] = (max_action * out).astype(o_ref.dtype)


def prepare_actor_params(params):
    """One-time prep (per parameter update): pad H/A to lane multiples, cast bf16.

    Hoists every weight-side conversion out of the per-call forward path.
    Zero-padding preserves results exactly: padded activation columns are
    exactly zero and padded rows of downstream weights are zero.
    """
    w1 = jnp.asarray(params["w1"], jnp.float32)
    w2 = jnp.asarray(params["w2"], jnp.float32)
    w3 = jnp.asarray(params["w3"], jnp.float32)
    b1 = jnp.reshape(jnp.asarray(params["b1"], jnp.float32), (1, -1))
    b2 = jnp.reshape(jnp.asarray(params["b2"], jnp.float32), (1, -1))
    b3 = jnp.reshape(jnp.asarray(params["b3"], jnp.float32), (1, -1))

    S, H = w1.shape
    A = w3.shape[1]
    Hp = _round_up(H, 128)   # lane-dense activations, MXU-aligned contractions
    Ap = _round_up(A, 128)   # lane-dense output (unmasked vst)

    if Hp != H:
        w1 = jnp.pad(w1, ((0, 0), (0, Hp - H)))
        b1 = jnp.pad(b1, ((0, 0), (0, Hp - H)))
        w2 = jnp.pad(w2, ((0, Hp - H), (0, Hp - H)))
        b2 = jnp.pad(b2, ((0, 0), (0, Hp - H)))
        w3 = jnp.pad(w3, ((0, Hp - H), (0, 0)))
    if Ap != A:
        w3 = jnp.pad(w3, ((0, 0), (0, Ap - A)))
        b3 = jnp.pad(b3, ((0, 0), (0, Ap - A)))

    return dict(
        w1=w1.astype(jnp.bfloat16), b1=b1,
        w2=w2.astype(jnp.bfloat16), b2=b2,
        w3=w3.astype(jnp.bfloat16), b3=b3,
        state_dim=S, hidden=H, action_dim=A,
        hidden_padded=Hp, action_padded=Ap,
    )


def actor_forward(state, prepped, max_action, *, block_batch=1024,
                  out_dtype=jnp.float32):
    """Fused Actor forward pass.

    state: [B, state_dim] float32
    prepped: output of prepare_actor_params (bf16 weights, lane-padded)
    max_action: Python float scale (compile-time constant, as in the nn.Module)
    """
    w1, b1, w2, b2, w3, b3 = (prepped[k] for k in ("w1", "b1", "w2", "b2", "w3", "b3"))
    B, S = state.shape
    assert S == prepped["state_dim"]
    A = prepped["action_dim"]
    Hp = prepped["hidden_padded"]
    Ap = prepped["action_padded"]

    # Batch tile: multiple of 16 (bf16 sublane packing), large enough to
    # amortize per-grid-step overhead on v5e/v6e, but capped at ceil(B/2) so
    # the "parallel" batch axis has >= 2 grid steps for 2-TC sharding on v7x.
    tb = max(16, min(_round_up(block_batch, 16), _round_up(pl.cdiv(B, 2), 16)))
    grid = (pl.cdiv(B, tb),)   # partial last tile handled by Pallas: no pad copy

    itemsize = lambda a: a.size * a.dtype.itemsize
    weight_bytes = sum(itemsize(a) for a in (w1, w2, w3, b1, b2, b3))
    # Single-buffer the invariant weights only when they are big enough for the
    # default double-buffering to matter for VMEM (v7x: 64 MiB physical).
    single_buffer = weight_bytes > (4 << 20)

    def const_spec(arr):
        nd = arr.ndim
        if single_buffer:
            return pl.BlockSpec(arr.shape, lambda i: (0,) * nd,
                                pipeline_mode=pl.Buffered(1))
        return pl.BlockSpec(arr.shape, lambda i: (0,) * nd)

    # Raise the scoped-VMEM limit only when the resident footprint needs it.
    buf_factor = 1 if single_buffer else 2
    est_vmem = (weight_bytes * buf_factor
                + 2 * (tb * S * 4 + tb * Ap * 4)     # double-buffered io tiles
                + 4 * tb * Hp * 4                    # in-flight f32 activations
                + (2 << 20))                         # slack
    vmem_limit = min(est_vmem, 128 << 20) if est_vmem > (32 << 20) else None

    flops = 2 * B * (S * Hp + Hp * Hp + Hp * Ap)
    bytes_accessed = (state.size * 4 + weight_bytes
                      + B * Ap * jnp.dtype(out_dtype).itemsize)

    kernel = functools.partial(_actor_kernel, max_action=float(max_action))
    out = pl.pallas_call(
        kernel,
        out_shape=jax.ShapeDtypeStruct((B, Ap), out_dtype),
        grid=grid,
        in_specs=[
            pl.BlockSpec((tb, S), lambda i: (i, 0)),   # state: tiled over batch
            const_spec(w1), const_spec(b1),            # weights/biases: VMEM-resident
            const_spec(w2), const_spec(b2),
            const_spec(w3), const_spec(b3),
        ],
        out_specs=pl.BlockSpec((tb, Ap), lambda i: (i, 0)),
        compiler_params=pltpu.CompilerParams(
            dimension_semantics=("parallel",),          # 2-TC sharding on v7x
            vmem_limit_bytes=vmem_limit),
        cost_estimate=pl.CostEstimate(
            flops=flops, transcendentals=B * Ap,
            bytes_accessed=bytes_accessed),
    )(state, w1, b1, w2, b2, w3, b3)

    return out if Ap == A else out[:, :A]


def init_actor_params(key, state_dim, action_dim, hidden_width):
    """Deterministic synthetic init (uniform, roughly matching torch Linear scale)."""
    ks = jax.random.split(key, 6)

    def lin(kw, kb, fan_in, fan_out):
        bound = 1.0 / jnp.sqrt(jnp.float32(fan_in))
        w = jax.random.uniform(kw, (fan_in, fan_out), jnp.float32, -bound, bound)
        b = jax.random.uniform(kb, (1, fan_out), jnp.float32, -bound, bound)
        return w, b

    w1, b1 = lin(ks[0], ks[1], state_dim, hidden_width)
    w2, b2 = lin(ks[2], ks[3], hidden_width, hidden_width)
    w3, b3 = lin(ks[4], ks[5], hidden_width, action_dim)
    return dict(w1=w1, b1=b1, w2=w2, b2=b2, w3=w3, b3=b3)


def actor_reference_f32(state, params, max_action):
    a = jnp.maximum(state @ params["w1"] + params["b1"], 0.0)
    a = jnp.maximum(a @ params["w2"] + params["b2"], 0.0)
    return max_action * jnp.tanh(a @ params["w3"] + params["b3"])


def actor_reference_bf16(state, params, max_action):
    """Reference mirroring the kernel's bf16-operand / f32-accumulate dots."""
    bf = jnp.bfloat16
    a = jnp.dot(state.astype(bf), params["w1"].astype(bf),
                preferred_element_type=jnp.float32)
    a = jnp.maximum(a + params["b1"], 0.0)
    a = jnp.dot(a.astype(bf), params["w2"].astype(bf),
                preferred_element_type=jnp.float32)
    a = jnp.maximum(a + params["b2"], 0.0)
    out = jnp.dot(a.astype(bf), params["w3"].astype(bf),
                  preferred_element_type=jnp.float32)
    return max_action * jnp.tanh(out + params["b3"])


if __name__ == "__main__":
    B, STATE_DIM, ACTION_DIM, HIDDEN = 2, 16, 4, 32
    MAX_ACTION = 2.0  # plays the role of float(action_space.high[0])

    key = jax.random.PRNGKey(0)
    k_state, k_params = jax.random.split(key)
    state = jax.random.normal(k_state, (B, STATE_DIM), jnp.float32)
    params = init_actor_params(k_params, STATE_DIM, ACTION_DIM, HIDDEN)

    # Weight prep (bf16 cast + lane padding) happens ONCE, outside the
    # per-call forward path.
    prepped = prepare_actor_params(params)

    out = actor_forward(state, prepped, MAX_ACTION)
    out = jax.block_until_ready(out)

    assert out.shape == (B, ACTION_DIM)
    ref_bf16 = actor_reference_bf16(state, params, MAX_ACTION)
    ref_f32 = actor_reference_f32(state, params, MAX_ACTION)
    assert jnp.allclose(out, ref_bf16, atol=2e-3, rtol=2e-3), \
        "mismatch vs bf16-matmul reference"
    assert jnp.allclose(out, ref_f32, atol=5e-2, rtol=5e-2), \
        "mismatch vs f32 reference (beyond bf16 rounding)"

    print("KERNEL_OK")
</pallas_src>

<mosaic_0001>
module attributes {stable_mosaic.version = 11 : i64} {
  func.func @_actor_kernel(%arg0: i32, %arg1: memref<16x16xf32, #tpu.memory_space<vmem>>, %arg2: memref<16x128xbf16, #tpu.memory_space<vmem>>, %arg3: memref<1x128xf32, #tpu.memory_space<vmem>>, %arg4: memref<128x128xbf16, #tpu.memory_space<vmem>>, %arg5: memref<1x128xf32, #tpu.memory_space<vmem>>, %arg6: memref<128x128xbf16, #tpu.memory_space<vmem>>, %arg7: memref<1x128xf32, #tpu.memory_space<vmem>>, %arg8: memref<16x128xf32, #tpu.memory_space<vmem>>) attributes {dimension_semantics = [#tpu.dimension_semantics<parallel>], iteration_bounds = array<i64: 1>, scalar_prefetch = 0 : i64, scratch_operands = 0 : i64, tpu.core_type = #tpu.core_type<tc>, window_params = [{transform_indices = @transform_0, window_bounds = array<i64: 16, 16>}, {pipeline_mode = #tpu.pipeline_mode<synchronous>, transform_indices = @transform_1, window_bounds = array<i64: 16, 128>}, {pipeline_mode = #tpu.pipeline_mode<synchronous>, transform_indices = @transform_2, window_bounds = array<i64: 1, 128>}, {pipeline_mode = #tpu.pipeline_mode<synchronous>, transform_indices = @transform_3, window_bounds = array<i64: 128, 128>}, {pipeline_mode = #tpu.pipeline_mode<synchronous>, transform_indices = @transform_4, window_bounds = array<i64: 1, 128>}, {pipeline_mode = #tpu.pipeline_mode<synchronous>, transform_indices = @transform_5, window_bounds = array<i64: 128, 128>}, {pipeline_mode = #tpu.pipeline_mode<synchronous>, transform_indices = @transform_6, window_bounds = array<i64: 1, 128>}, {transform_indices = @transform_7, window_bounds = array<i64: 16, 128>}]} {
    %c0 = arith.constant 0 : index
    %c0_0 = arith.constant 0 : index
    %0 = vector.load %arg1[%c0, %c0_0] : memref<16x16xf32, #tpu.memory_space<vmem>>, vector<16x16xf32>
    %1 = arith.truncf %0 : vector<16x16xf32> to vector<16x16xbf16>
    %c0_1 = arith.constant 0 : index
    %c0_2 = arith.constant 0 : index
    %2 = vector.load %arg2[%c0_1, %c0_2] : memref<16x128xbf16, #tpu.memory_space<vmem>>, vector<16x128xbf16>
    %cst = arith.constant dense<0.000000e+00> : vector<16x128xf32>
    %3 = tpu.matmul %1, %2, %cst {dimension_numbers = #tpu.dot_dimension_numbers<[1], [0], [0], [1], [0, 0, 1, 1], [], []>} : vector<16x16xbf16>, vector<16x128xbf16>, vector<16x128xf32> -> vector<16x128xf32>
    %c0_3 = arith.constant 0 : index
    %c0_4 = arith.constant 0 : index
    %4 = vector.load %arg3[%c0_3, %c0_4] : memref<1x128xf32, #tpu.memory_space<vmem>>, vector<1x128xf32>
    %5 = vector.broadcast %4 : vector<1x128xf32> to vector<16x128xf32>
    %6 = arith.addf %3, %5 : vector<16x128xf32>
    %cst_5 = arith.constant 0.000000e+00 : f32
    %7 = vector.broadcast %cst_5 : f32 to vector<16x128xf32>
    %8 = arith.maximumf %6, %7 : vector<16x128xf32>
    %9 = arith.truncf %8 : vector<16x128xf32> to vector<16x128xbf16>
    %c0_6 = arith.constant 0 : index
    %c0_7 = arith.constant 0 : index
    %10 = vector.load %arg4[%c0_6, %c0_7] : memref<128x128xbf16, #tpu.memory_space<vmem>>, vector<128x128xbf16>
    %cst_8 = arith.constant dense<0.000000e+00> : vector<16x128xf32>
    %11 = tpu.matmul %9, %10, %cst_8 {dimension_numbers = #tpu.dot_dimension_numbers<[1], [0], [0], [1], [0, 0, 1, 1], [], []>} : vector<16x128xbf16>, vector<128x128xbf16>, vector<16x128xf32> -> vector<16x128xf32>
    %c0_9 = arith.constant 0 : index
    %c0_10 = arith.constant 0 : index
    %12 = vector.load %arg5[%c0_9, %c0_10] : memref<1x128xf32, #tpu.memory_space<vmem>>, vector<1x128xf32>
    %13 = vector.broadcast %12 : vector<1x128xf32> to vector<16x128xf32>
    %14 = arith.addf %11, %13 : vector<16x128xf32>
    %cst_11 = arith.constant 0.000000e+00 : f32
    %15 = vector.broadcast %cst_11 : f32 to vector<16x128xf32>
    %16 = arith.maximumf %14, %15 : vector<16x128xf32>
    %17 = arith.truncf %16 : vector<16x128xf32> to vector<16x128xbf16>
    %c0_12 = arith.constant 0 : index
    %c0_13 = arith.constant 0 : index
    %18 = vector.load %arg6[%c0_12, %c0_13] : memref<128x128xbf16, #tpu.memory_space<vmem>>, vector<128x128xbf16>
    %cst_14 = arith.constant dense<0.000000e+00> : vector<16x128xf32>
    %19 = tpu.matmul %17, %18, %cst_14 {dimension_numbers = #tpu.dot_dimension_numbers<[1], [0], [0], [1], [0, 0, 1, 1], [], []>} : vector<16x128xbf16>, vector<128x128xbf16>, vector<16x128xf32> -> vector<16x128xf32>
    %c0_15 = arith.constant 0 : index
    %c0_16 = arith.constant 0 : index
    %20 = vector.load %arg7[%c0_15, %c0_16] : memref<1x128xf32, #tpu.memory_space<vmem>>, vector<1x128xf32>
    %21 = vector.broadcast %20 : vector<1x128xf32> to vector<16x128xf32>
    %22 = arith.addf %19, %21 : vector<16x128xf32>
    %23 = math.tanh %22 : vector<16x128xf32>
    %cst_17 = arith.constant 2.000000e+00 : f32
    %24 = vector.broadcast %cst_17 : f32 to vector<16x128xf32>
    %25 = arith.mulf %24, %23 : vector<16x128xf32>
    %c0_18 = arith.constant 0 : index
    %c0_19 = arith.constant 0 : index
    %26 = vector.load %arg8[%c0_18, %c0_19] : memref<16x128xf32, #tpu.memory_space<vmem>>, vector<16x128xf32>
    tpu.vector_store %arg8[%c0_18, %c0_19], %25 {strides = array<i32>} : memref<16x128xf32, #tpu.memory_space<vmem>>, vector<16x128xf32>,
    return
  }
  func.func @transform_0(%arg0: i32) -> (i32, i32) {
    %c0_i32 = arith.constant 0 : i32
    %c0_i32_0 = arith.constant 0 : i32
    return %arg0, %c0_i32 : i32, i32
  }
  func.func @transform_1(%arg0: i32) -> (i32, i32) {
    %c0_i32 = arith.constant 0 : i32
    %c0_i32_0 = arith.constant 0 : i32
    %c0_i32_1 = arith.constant 0 : i32
    return %c0_i32, %c0_i32_0 : i32, i32
  }
  func.func @transform_2(%arg0: i32) -> (i32, i32) {
    %c0_i32 = arith.constant 0 : i32
    %c0_i32_0 = arith.constant 0 : i32
    %c0_i32_1 = arith.constant 0 : i32
    return %c0_i32, %c0_i32_0 : i32, i32
  }
  func.func @transform_3(%arg0: i32) -> (i32, i32) {
    %c0_i32 = arith.constant 0 : i32
    %c0_i32_0 = arith.constant 0 : i32
    %c0_i32_1 = arith.constant 0 : i32
    return %c0_i32, %c0_i32_0 : i32, i32
  }
  func.func @transform_4(%arg0: i32) -> (i32, i32) {
    %c0_i32 = arith.constant 0 : i32
    %c0_i32_0 = arith.constant 0 : i32
    %c0_i32_1 = arith.constant 0 : i32
    return %c0_i32, %c0_i32_0 : i32, i32
  }
  func.func @transform_5(%arg0: i32) -> (i32, i32) {
    %c0_i32 = arith.constant 0 : i32
    %c0_i32_0 = arith.constant 0 : i32
    %c0_i32_1 = arith.constant 0 : i32
    return %c0_i32, %c0_i32_0 : i32, i32
  }
  func.func @transform_6(%arg0: i32) -> (i32, i32) {
    %c0_i32 = arith.constant 0 : i32
    %c0_i32_0 = arith.constant 0 : i32
    %c0_i32_1 = arith.constant 0 : i32
    return %c0_i32, %c0_i32_0 : i32, i32
  }
  func.func @transform_7(%arg0: i32) -> (i32, i32) {
    %c0_i32 = arith.constant 0 : i32
    %c0_i32_0 = arith.constant 0 : i32
    return %arg0, %c0_i32 : i32, i32
  }
}

</mosaic_0001>

<bundles_post_ra>
// kernel: tpu_custom_call.1
= control target key start
LH: loop header
LB: loop body
LE: loop exit
PB: predicated region body
PF: predicated region fallthrough
CT: control target
= control target key end

     0   :  { %12 = vsyncpa [#allocation3], 0  ;;  %s741_s0 = inlined_call_operand.hbm [shape: f32[2,16], index: 0, kind: input, shape index: {}]   ;;  %s742_s1 = inlined_call_operand.hbm [shape: bf16[16,128], index: 1, kind: input, shape index: {}]   ;;  %s743_s2 = inlined_call_operand.vmem [shape: f32[1,128], index: 2, kind: input, shape index: {}]   ;;  %s744_s3 = inlined_call_operand.hbm [shape: bf16[128,128], index: 3, kind: input, shape index: {}]   ;;  %s745_s4 = inlined_call_operand.vmem [shape: f32[1,128], index: 4, kind: input, shape index: {}]   ;;  %s746_s5 = inlined_call_operand.hbm [shape: bf16[128,128], index: 5, kind: input, shape index: {}]   ;;  %s747_s6 = inlined_call_operand.vmem [shape: f32[1,128], index: 6, kind: input, shape index: {}]   ;;  %s748_s7 = inlined_call_operand.hbm [shape: f32[2,128], index: 7, kind: output, shape index: {}]  }
   0x1   :  { %13 = vsyncpa [#allocation6], 0 }
   0x2   :  { %14 = vsyncpa [#allocation9], 0 }
   0x3   :  { %15 = vsyncpa [#allocation4], 0 }
   0x4   :  { %20 = vsyncadd [#allocation3], 224  ;;  %s628_s24 = smov [#allocation5]  }
   0x5   :  { %s33_s25 = sshll.u32 %s628_s24, 4  ;;  %s34_s25 = int_to_ptr.vmem [resolvable:$true] %s33_s25 }
   0x6   :  { %s528_s26 = scalar_lea.vmem %s34_s25, 128  ;;  %p533_p1 = scmp.lt.s32.totalorder %s34_s25, %s34_s25 }
   0x7   :  { %p529_p0 = scmp.ne.s32.totalorder %s34_s25, %s528_s26  ;;  %p534_p2 = scmp.lt.s32.totalorder %s528_s26, %s528_s26 }
   0x9   :  { %p535_p3 = por %p534_p2, %p533_p1 }
   0xb   :  { %p536_p4 = pnand %p535_p3, %p529_p0 }
   0xd   :  { %539 = shalt.err (!%p536_p4)
}
   0xe   :  { %s629_s27 = smov 64   ;;  %s630_s28 = smov 4  }
   0xf   :  { %39 = dma.hbm_to_vmem [thread:$0]  %s742_s1, 128, %s34_s25, [#allocation6], %s629_s27, %s629_s27, %s630_s28  }
  0x10   :  { %s631_s8 = smov [#allocation2]  }
  0x11   :  { %s21_s9 = sshll.u32 %s631_s8, 4  ;;  %s22_s9 = int_to_ptr.vmem [resolvable:$true] %s21_s9 }
  0x12   :  { %s548_s10 = scalar_lea.vmem %s22_s9, 32  ;;  %s552_s11 = scalar_lea.vmem %s22_s9, 256 }
  0x13   :  { %p549_p5 = scmp.ne.s32.totalorder %s22_s9, %s548_s10  ;;  %p553_p6 = scmp.lt.s32.totalorder %s22_s9, %s22_s9 }
  0x14   :  { %p554_p7 = scmp.lt.s32.totalorder %s552_s11, %s548_s10 }
  0x16   :  { %p555_p8 = por %p554_p7, %p553_p6 }
  0x18   :  { %p556_p9 = pnand %p555_p8, %p549_p5 }
  0x1a   :  { %559 = shalt.err (!%p556_p9)
}
  0x1b   :  { %s632_s12 = smov 32   ;;  %s633_s13 = smov 2  }
  0x1c   :  { %27 = dma.hbm_to_vmem [thread:$0]  %s741_s0, 32, %s22_s9, [#allocation3], %s632_s12, %s632_s12, %s633_s13  }
  0x1d   :  { %s634_s1 = smov [#allocation7]   ;;  %s635_s17 = smov [#allocation8]  }
  0x1e   :  { %s47_s16 = sshll.u32 %s634_s1, 4  ;;  %s61_s18 = sshll.u32 %s635_s17, 4  ;;  %s48_s16 = int_to_ptr.vmem [resolvable:$true] %s47_s16  ;;  %s62_s18 = int_to_ptr.vmem [resolvable:$true] %s61_s18 }
  0x1f   :  { %s568_s19 = scalar_lea.vmem %s48_s16, 1024  ;;  %p573_p11 = scmp.lt.s32.totalorder %s48_s16, %s48_s16 }
  0x20   :  { %p569_p10 = scmp.ne.s32.totalorder %s48_s16, %s568_s19  ;;  %p574_p12 = scmp.lt.s32.totalorder %s568_s19, %s568_s19 }
  0x22   :  { %p575_p13 = por %p574_p12, %p573_p11 }
  0x24   :  { %p576_p0 = pnand %p575_p13, %p569_p10 }
  0x26   :  { %579 = shalt.err (!%p576_p0)
}
  0x27   :  { %53 = dma.hbm_to_vmem [thread:$0]  %s744_s3, 1024, %s48_s16, [#allocation6], %s629_s27, %s629_s27, %s630_s28  }
  0x28   :  { %s588_s0 = scalar_lea.vmem %s62_s18, 1024  ;;  %p593_p2 = scmp.lt.s32.totalorder %s62_s18, %s62_s18 }
  0x29   :  { %p589_p1 = scmp.ne.s32.totalorder %s62_s18, %s588_s0  ;;  %p594_p3 = scmp.lt.s32.totalorder %s588_s0, %s588_s0 }
  0x2b   :  { %p595_p4 = por %p594_p3, %p593_p2 }
  0x2d   :  { %p596_p5 = pnand %p595_p4, %p589_p1 }
  0x2f   :  { %599 = shalt.err (!%p596_p5)
}
  0x30   :  { %67 = dma.hbm_to_vmem [thread:$0]  %s746_s5, 1024, %s62_s18, [#allocation9], %s629_s27, %s629_s27, %s630_s28  }
  0x31   :  { %620 = dma.done.wait [#allocation3], 256  }
  0x32   :  { %621 = vsyncadd [#allocation3], 4294967040 }
  0x33   :  { %622 = dma.done.wait [#allocation6], 1152  }
  0x34   :  { %623 = vsyncadd [#allocation6], 4294966144 }
  0x35   :  { %624 = dma.done.wait [#allocation9], 1024  }
  0x36   :  { %625 = vsyncadd [#allocation9], 4294966272  ;;  %v636_v0 = vmov 0.0   ;;  %vm637_vm0 = vmmov 0   ;;  %v499_v1 = vld [vmem:[#allocation5] sm:$0xff]   ;;  %v83_v2 = vld [vmem:[#allocation2] sm:$0xff] }
  0x37   :  { %442 = vmatprep.subr.bf16.mxu0 %v636_v0  ;;  %444 = vmatprep.mubr.msk.bf16.mxu0 %vm637_vm0, %v636_v0  ;;  %v84_v3 = vld [vmem:[#allocation2 + $0x8] sm:$0xff]  ;;  %vm101_vm1 = vcmask 130048   ;;  %v500_v5 = vld [vmem:[#allocation7 + $0x38] sm:$0xff]   ;;  %v502_v7 = vld [vmem:[#allocation7 + $0x28] sm:$0xff]  }
  0x38   :  { %448 = vmatprep.subr.bf16.mxu1 %v636_v0  ;;  %464 = vmatprep.mubr.msk.bf16.mxu1 %vm637_vm0, %v636_v0  ;;  %v85_v4 = vpack.c.bf16 %v84_v3, %v83_v2  ;;  %v501_v6 = vld [vmem:[#allocation7 + $0x30] sm:$0xff]   ;;  %v503_v8 = vld [vmem:[#allocation7 + $0x20] sm:$0xff]   ;;  %v504_v9 = vld [vmem:[#allocation7 + $0x18] sm:$0xff]  }
  0x39   :  { %443 = vmatpush3.bf16.msra.mxu0 %v499_v1  ;;  %449 = vmatpush3.bf16.msra.mxu1 %v500_v5  ;;  %v505_v10 = vld [vmem:[#allocation7 + $0x10] sm:$0xff]   ;;  %v506_v11 = vld [vmem:[#allocation7 + $0x8] sm:$0xff]   ;;  %v507_v12 = vld [vmem:[#allocation7] sm:$0xff]  }
  0x3a   :  { %468 = vmatprep.subr.bf16.mxu0 %v636_v0  ;;  %450 = vmatprep.subr.bf16.mxu1 %v636_v0  ;;  %v508_v13 = vld [vmem:[#allocation8 + $0x38] sm:$0xff]   ;;  %v509_v14 = vld [vmem:[#allocation8 + $0x30] sm:$0xff]   ;;  %v510_v15 = vld [vmem:[#allocation8 + $0x28] sm:$0xff]  }
  0x3b   :  { %v511_v16 = vld [vmem:[#allocation8 + $0x20] sm:$0xff]   ;;  %v512_v17 = vld [vmem:[#allocation8 + $0x18] sm:$0xff]   ;;  %v401_v18 = vld [vmem:[%s743_s2] ss:$0 sm:$0xff] }
  0x3c   :  { %445 = vmatmul.mubr.msk.bf16.vlgmr.msra.gmra.mxu0 %vm101_vm1, %v85_v4  ;;  %v513_v28 = vld [vmem:[#allocation8 + $0x10] sm:$0xff]   ;;  %v514_v29 = vld [vmem:[#allocation8 + $0x8] sm:$0xff]   ;;  %v515_v30 = vld [vmem:[#allocation8] sm:$0xff]  }
  0x3d   :  { %484 = vmatprep.mubr.msk.bf16.mxu0 %vm637_vm0, %v636_v0  ;;  %451 = vmatpush3.bf16.msra.mxu1 %v501_v6  ;;  %v404_v31 = vld [vmem:[%s745_s4] ss:$0 sm:$0xff] }
  0x3e   :  { %452 = vmatprep.subr.bf16.mxu1 %v636_v0  ;;  %469 = vmatpush3.bf16.msra.mxu0 %v508_v13  ;;  %v413_v41 = vld [vmem:[%s747_s6] ss:$0 sm:$0xff] }
  0x3f   :  { %470 = vmatprep.subr.bf16.mxu0 %v636_v0 }
  0x41   :  { %453 = vmatpush3.bf16.msra.mxu1 %v502_v7 }
  0x42   :  { %454 = vmatprep.subr.bf16.mxu1 %v636_v0  ;;  %471 = vmatpush3.bf16.msra.mxu0 %v509_v14 }
  0x43   :  { %472 = vmatprep.subr.bf16.mxu0 %v636_v0 }
  0x45   :  { %455 = vmatpush3.bf16.msra.mxu1 %v503_v8 }
  0x46   :  { %456 = vmatprep.subr.bf16.mxu1 %v636_v0  ;;  %473 = vmatpush3.bf16.msra.mxu0 %v510_v15 }
  0x47   :  { %474 = vmatprep.subr.bf16.mxu0 %v636_v0 }
  0x49   :  { %457 = vmatpush3.bf16.msra.mxu1 %v504_v9 }
  0x4a   :  { %458 = vmatprep.subr.bf16.mxu1 %v636_v0  ;;  %475 = vmatpush3.bf16.msra.mxu0 %v511_v16 }
  0x4b   :  { %476 = vmatprep.subr.bf16.mxu0 %v636_v0 }
  0x4d   :  { %459 = vmatpush3.bf16.msra.mxu1 %v505_v10 }
  0x4e   :  { %460 = vmatprep.subr.bf16.mxu1 %v636_v0  ;;  %477 = vmatpush3.bf16.msra.mxu0 %v512_v17 }
  0x4f   :  { %478 = vmatprep.subr.bf16.mxu0 %v636_v0 }
  0x51   :  { %461 = vmatpush3.bf16.msra.mxu1 %v506_v11 }
  0x52   :  { %462 = vmatprep.subr.bf16.mxu1 %v636_v0  ;;  %479 = vmatpush3.bf16.msra.mxu0 %v513_v28 }
  0x53   :  { %480 = vmatprep.subr.bf16.mxu0 %v636_v0 }
  0x55   :  { %463 = vmatpush3.bf16.msra.mxu1 %v507_v12 }
  0x56   :  { %481 = vmatpush3.bf16.msra.mxu0 %v514_v29 }
  0x57   :  { %482 = vmatprep.subr.bf16.mxu0 %v636_v0 }
  0x5a   :  { %483 = vmatpush3.bf16.msra.mxu0 %v515_v30 }
  0xfc   :  { %v139_v19 = vpop.f32.mrf.mxu0 }
  0xfd   :  { %v140_v21 = vadd.f32 %v401_v18, %v139_v19 }
  0xfe   :  { %v446_v20 = vpop.f32.mrf.mxu0 }
  0xff   :  { %v146_v25 = vmax.f32 %v140_v21, 0.0 }
 0x100   :  { %v142_v22 = vpop.f32.mrf.mxu0 }
 0x101   :  { %v143_v23 = vadd.f32 %v401_v18, %v142_v22 }
 0x102   :  { %v447_v24 = vpop.f32.mrf.mxu0 }
 0x103   :  { %v147_v26 = vmax.f32 %v143_v23, 0.0 }
 0x105   :  { %v148_v27 = vpack.c.bf16 %v147_v26, %v146_v25 }
 0x107   :  { %465 = vmatmul.mubr.bf16.vlgmr.msra.gmra.mxu1 %v148_v27 }
 0x1c7   :  { %v254_v32 = vpop.f32.mrf.mxu1 }
 0x1c8   :  { %v255_v34 = vadd.f32 %v404_v31, %v254_v32 }
 0x1c9   :  { %v466_v33 = vpop.f32.mrf.mxu1 }
 0x1ca   :  { %v261_v38 = vmax.f32 %v255_v34, 0.0 }
 0x1cb   :  { %v257_v35 = vpop.f32.mrf.mxu1 }
 0x1cc   :  { %v258_v36 = vadd.f32 %v404_v31, %v257_v35 }
 0x1cd   :  { %v467_v37 = vpop.f32.mrf.mxu1 }
 0x1ce   :  { %v262_v39 = vmax.f32 %v258_v36, 0.0 }
 0x1d0   :  { %v263_v40 = vpack.c.bf16 %v262_v39, %v261_v38 }
 0x1d2   :  { %485 = vmatmul.mubr.bf16.vlgmr.msra.gmra.mxu0 %v263_v40 }
 0x292   :  { %v369_v42 = vpop.f32.mrf.mxu0 }
 0x293   :  { %v370_v43 = vadd.f32 %v413_v41, %v369_v42 }
 0x294   :  { %v486_v44 = vpop.f32.mrf.mxu0 }
 0x295   :  { %516 = vtanh.f32 %v370_v43 }
 0x296   :  { %v372_v45 = vpop.f32.mrf.mxu0 }
 0x297   :  { %v373_v46 = vadd.f32 %v413_v41, %v372_v45 }
 0x298   :  { %v487_v47 = vpop.f32.mrf.mxu0 }
 0x299   :  { %518 = vtanh.f32 %v373_v46 }
 0x2a2   :  { %v517_v48 = vpop.eup %516 }
 0x2a3   :  { %v378_v49 = vmul.f32 2.0, %v517_v48 }
 0x2a5   :  { %380 = vst [vmem:[#allocation10] sm:$0xff] %v378_v49 }
 0x2a6   :  { %v519_v50 = vpop.eup %518 }
 0x2a7   :  { %v379_v51 = vmul.f32 2.0, %v519_v50 }
 0x2a9   :  { %381 = vst [vmem:[#allocation10 + $0x8] sm:$0xff] %v379_v51 }
 0x2aa   :  { %386 = vsyncadd [#allocation4], 224  ;;  %s638_s4 = smov [#allocation10]  }
 0x2ab   :  { %s387_s27 = sshll.u32 %s638_s4, 4  ;;  %s388_s27 = int_to_ptr.vmem [resolvable:$true] %s387_s27 }
 0x2ac   :  { %s600_s28 = scalar_lea.vmem %s388_s27, 32  ;;  %s604_s6 = scalar_lea.vmem %s388_s27, 256 }
 0x2ad   :  { %p601_p6 = scmp.ne.s32.totalorder %s388_s27, %s600_s28  ;;  %p605_p7 = scmp.lt.s32.totalorder %s388_s27, %s388_s27 }
 0x2ae   :  { %p606_p8 = scmp.lt.s32.totalorder %s604_s6, %s600_s28 }
 0x2b0   :  { %p607_p9 = por %p606_p8, %p605_p7 }
 0x2b2   :  { %p608_p10 = pnand %p607_p9, %p601_p6 }
 0x2b4   :  { %611 = shalt.err (!%p608_p10)
}
 0x2b5   :  { %393 = dma.vmem_to_hbm [thread:$0]  %s388_s27, 32, %s748_s7, [#allocation4], %s632_s12, %s632_s12, %s633_s13  }
 0x2b6   :  { %626 = dma.done.wait [#allocation4], 256  }
 0x2b7   :  { %627 = vsyncadd [#allocation4], 4294967040 }
 0x2b8   :  { %397 = vsyncpa [#allocation3], 1 }
 0x2b9   :  { %398 = vsyncpa [#allocation6], 1 }
 0x2ba   :  { %399 = vsyncpa [#allocation9], 1 }
 0x2bb   :  { %400 = vsyncpa [#allocation4], 1 }

</bundles_post_ra>
